<compile_context>
chip_gen: v7x
topology: tpu7x:2x2x1
jax: 0.10.0
libtpu: 0.0.40
codegen_flags: <defaults>
</compile_context>

<pallas_src>
import functools
from typing import NamedTuple, Tuple

import jax
import jax.numpy as jnp
from jax.experimental import pallas as pl
from jax.experimental.pallas import tpu as pltpu


def _round_up(n: int, m: int) -> int:
    return ((n + m - 1) // m) * m


# --------------------------------------------------------------------------
# Chip introspection (best effort; conservative defaults if unavailable).
# --------------------------------------------------------------------------
def _chip_info():
    vmem_capacity = 64 * 1024 * 1024        # conservative default (v7x-sized)
    num_tc = 1
    try:
        info = pltpu.get_tpu_info()
        cap = getattr(info, "vmem_capacity_bytes", None)
        if cap:
            vmem_capacity = int(cap)
    except Exception:
        pass
    try:
        kind = jax.devices()[0].device_kind.lower()
        # v7x has 2 TensorCores per chip; v4/v5p are megacore (2 TCs).
        if ("v7" in kind) or ("v4" in kind) or ("v5p" in kind):
            num_tc = 2
    except Exception:
        pass
    # Leave headroom below physical VMEM (<=48 MiB on a 64 MiB v7x,
    # ~96 MiB on 128 MiB v5e/v6e).
    vmem_limit = min(int(vmem_capacity * 0.75), 96 * 1024 * 1024)
    vmem_limit = max(vmem_limit, 16 * 1024 * 1024)
    return vmem_limit, num_tc


# --------------------------------------------------------------------------
# One-time parameter preparation (pad to 128 lanes, cast weights to bf16).
# --------------------------------------------------------------------------
class PreparedMLP(NamedTuple):
    w_pad: Tuple[jnp.ndarray, ...]   # bf16 (in_pad_i, out_pad_i)
    b_stack: jnp.ndarray             # f32  (n_layers, max_out_pad)
    sizes: Tuple[int, ...]           # logical [in, h0, ..., out]
    padded: Tuple[int, ...]          # 128-padded sizes


def prepare_params(weights, biases) -> PreparedMLP:
    """Pad feature dims to multiples of 128 and cast weights to bf16.

    Call ONCE per parameter set; the result is reused by every forward call so
    the per-call path never re-pads / re-casts parameters.
    """
    n_layers = len(weights)
    sizes = [weights[0].shape[0]] + [w.shape[1] for w in weights]
    padded = [_round_up(s, 128) for s in sizes]
    max_out_pad = max(padded[1:])

    w_pad = []
    for li, w in enumerate(weights):
        wp = jnp.zeros((padded[li], padded[li + 1]), jnp.float32)
        wp = wp.at[: w.shape[0], : w.shape[1]].set(w)
        w_pad.append(wp.astype(jnp.bfloat16))
    b_stack = jnp.zeros((n_layers, max_out_pad), jnp.float32)
    for li, b in enumerate(biases):
        b_stack = b_stack.at[li, : b.shape[0]].set(b)

    return PreparedMLP(tuple(w_pad), b_stack, tuple(sizes), tuple(padded))


# --------------------------------------------------------------------------
# Kernel body: whole MLP for one batch tile.
# --------------------------------------------------------------------------
def _mlp_kernel(n_layers, out_pads, x_ref, *refs):
    """refs = (w0, ..., w_{L-1}, bias_stack, out_ref).

    x and weights are bf16; MXU accumulates in f32; bias add + ReLU stay f32.
    """
    b_ref = refs[n_layers]
    out_ref = refs[n_layers + 1]

    h = x_ref[...]                                           # bf16 (tile, in_pad)
    for li in range(n_layers):
        w = refs[li][...]                                    # bf16 (in_pad, out_pad)
        b = b_ref[li:li + 1, :out_pads[li]]                  # f32  (1, out_pad)
        acc = jnp.dot(h, w, preferred_element_type=jnp.float32) + b
        if li < n_layers - 1:                                # ReLU on hidden layers
            acc = jnp.maximum(acc, 0.0)
            h = acc.astype(jnp.bfloat16)                     # bf16 MXU input
        else:
            h = acc
    out_ref[...] = h.astype(out_ref.dtype)


# --------------------------------------------------------------------------
# Batch-tile selection with explicit VMEM accounting.
# --------------------------------------------------------------------------
def _choose_batch_tile(batch, padded, n_layers, vmem_limit, num_tc) -> int:
    max_w = max(padded)
    # Batch-independent residents: all bf16 weight blocks + f32 bias stack.
    weight_bytes = sum(padded[i] * padded[i + 1] * 2 for i in range(n_layers))
    bias_bytes = n_layers * max(padded[1:]) * 4
    fixed = weight_bytes + bias_bytes
    # Per-row bytes: 2x bf16 x tile (double-buffered), 2x f32 out tile,
    # ~3 live f32 activation slabs of the widest layer around each dot/cast.
    per_row = 2 * padded[0] * 2 + 2 * padded[-1] * 4 + 3 * max_w * 4
    budget = int(vmem_limit * 0.8) - fixed
    rows = budget // per_row if budget > 0 else 8
    tile = min(max(batch, 8), max(rows, 8), 2048)
    # Only split the batch for multi-TensorCore chips (v7x); keep each step's
    # M large and use exactly num_tc steps.
    if num_tc > 1 and batch >= 16 * num_tc and tile * num_tc > batch:
        tile = max(batch // num_tc, 8)
    tile = max(8, (tile // 8) * 8)                           # sublane-aligned
    return tile


# --------------------------------------------------------------------------
# Forward wrapper.
# --------------------------------------------------------------------------
def _build_call(kernel, n_layers, padded, max_out_pad, batch_tile, Bp, out_pad,
                compiler_params, cost_estimate, single_buffer_params):
    param_kwargs = {}
    if single_buffer_params:
        # Constant index_map across grid steps -> one resident copy suffices.
        param_kwargs = dict(pipeline_mode=pl.Buffered(1))

    in_specs = [pl.BlockSpec((batch_tile, padded[0]), lambda i: (i, 0))]
    for li in range(n_layers):
        in_specs.append(
            pl.BlockSpec((padded[li], padded[li + 1]), lambda i: (0, 0),
                         **param_kwargs))
    in_specs.append(
        pl.BlockSpec((n_layers, max_out_pad), lambda i: (0, 0), **param_kwargs))
    out_specs = pl.BlockSpec((batch_tile, out_pad), lambda i: (i, 0))

    return pl.pallas_call(
        kernel,
        out_shape=jax.ShapeDtypeStruct((Bp, out_pad), jnp.float32),
        grid=(Bp // batch_tile,),
        in_specs=in_specs,
        out_specs=out_specs,
        compiler_params=compiler_params,
        cost_estimate=cost_estimate,
    )


def mlp_forward(x, params: PreparedMLP, *, batch_tile=None):
    """Fused MLP forward.  x: (B, input_size) f32; returns (B, output_size) f32."""
    B, in_size = x.shape
    w_pad, b_stack, sizes, padded = params
    n_layers = len(w_pad)
    assert in_size == sizes[0]
    out_size = sizes[-1]
    out_pad = padded[-1]
    max_out_pad = b_stack.shape[1]

    vmem_limit, num_tc = _chip_info()
    if batch_tile is None:
        batch_tile = _choose_batch_tile(B, padded, n_layers, vmem_limit, num_tc)
    Bp = _round_up(max(B, 1), batch_tile)

    # Per-call input prep only: pad + cast x to bf16 (halves x DMA bytes).
    xp = jnp.zeros((Bp, padded[0]), jnp.float32).at[:B, :in_size].set(x)
    xp = xp.astype(jnp.bfloat16)

    flops = 2 * Bp * sum(padded[li] * padded[li + 1] for li in range(n_layers))
    bytes_accessed = (xp.size * 2 + sum(w.size * 2 for w in w_pad)
                      + b_stack.size * 4 + Bp * out_pad * 4)
    cost_estimate = pl.CostEstimate(flops=flops, transcendentals=0,
                                    bytes_accessed=int(bytes_accessed))
    compiler_params = pltpu.CompilerParams(
        dimension_semantics=("parallel",),
        vmem_limit_bytes=int(vmem_limit),
    )

    kernel = functools.partial(_mlp_kernel, n_layers, tuple(padded[1:]))

    # Try single-buffered parameter blocks first; fall back to the default
    # pipelining if this JAX build rejects pipeline_mode / Buffered(1).
    out = None
    last_err = None
    for single_buf in (True, False):
        try:
            call = _build_call(kernel, n_layers, padded, max_out_pad, batch_tile,
                               Bp, out_pad, compiler_params, cost_estimate,
                               single_buf)
            out = jax.block_until_ready(call(xp, *w_pad, b_stack))
            break
        except Exception as e:                     # noqa: BLE001
            last_err = e
            out = None
    if out is None:
        raise last_err

    # Strip batch + lane padding outside the kernel (store stays lane-dense).
    return out[:B, :out_size]


# --------------------------------------------------------------------------
# Init + references.
# --------------------------------------------------------------------------
def init_params(key, input_size, output_size, hidden_sizes):
    """Deterministic init mimicking torch.nn.Linear shapes.

    Returns weights as (in, out) (transposed vs torch's (out, in)) and biases (out,).
    """
    sizes = [input_size] + list(hidden_sizes) + [output_size]
    weights, biases = [], []
    for i in range(len(sizes) - 1):
        fan_in, fan_out = sizes[i], sizes[i + 1]
        key, kw, kb = jax.random.split(key, 3)
        bound = 1.0 / jnp.sqrt(fan_in)
        w = jax.random.uniform(kw, (fan_in, fan_out), jnp.float32, -bound, bound)
        b = jax.random.uniform(kb, (fan_out,), jnp.float32, -bound, bound)
        weights.append(w)
        biases.append(b)
    return weights, biases


def mlp_reference_f32(x, weights, biases):
    h = x
    n = len(weights)
    for i, (w, b) in enumerate(zip(weights, biases)):
        h = h @ w + b
        if i < n - 1:
            h = jnp.maximum(h, 0.0)
    return h


def mlp_reference_bf16(x, weights, biases):
    """Mirrors the kernel's bf16-MXU / f32-accumulate math."""
    h = x.astype(jnp.float32)
    n = len(weights)
    for i, (w, b) in enumerate(zip(weights, biases)):
        h = jnp.dot(h.astype(jnp.bfloat16), w.astype(jnp.bfloat16),
                    preferred_element_type=jnp.float32) + b
        if i < n - 1:
            h = jnp.maximum(h, 0.0)
    return h


if __name__ == "__main__":
    key = jax.random.PRNGKey(0)

    input_size = 16
    output_size = 4
    hidden_sizes = [32, 32]
    batch = 64

    kx, kp = jax.random.split(key)
    x = jax.random.normal(kx, (batch, input_size), jnp.float32)
    weights, biases = init_params(kp, input_size, output_size, hidden_sizes)

    # One-time parameter preparation (padding + bf16 cast hoisted out of the
    # per-call path).
    params = prepare_params(weights, biases)

    out = mlp_forward(x, params)
    out = jax.block_until_ready(out)
    assert out.shape == (batch, output_size)

    ref_bf16 = mlp_reference_bf16(x, weights, biases)
    ref_f32 = mlp_reference_f32(x, weights, biases)
    assert jnp.allclose(out, ref_bf16, atol=1e-3, rtol=1e-3), "mismatch vs bf16 reference"
    assert jnp.allclose(out, ref_f32, atol=3e-2, rtol=3e-2), "mismatch vs f32 reference"

    print("KERNEL_OK")
</pallas_src>

<mosaic_0001>
module attributes {stable_mosaic.version = 11 : i64} {
  func.func @_mlp_kernel(%arg0: i32, %arg1: memref<64x128xbf16, #tpu.memory_space<vmem>>, %arg2: memref<128x128xbf16, #tpu.memory_space<vmem>>, %arg3: memref<128x128xbf16, #tpu.memory_space<vmem>>, %arg4: memref<128x128xbf16, #tpu.memory_space<vmem>>, %arg5: memref<3x128xf32, #tpu.memory_space<vmem>>, %arg6: memref<64x128xf32, #tpu.memory_space<vmem>>) attributes {dimension_semantics = [#tpu.dimension_semantics<parallel>], iteration_bounds = array<i64: 1>, scalar_prefetch = 0 : i64, scratch_operands = 0 : i64, tpu.core_type = #tpu.core_type<tc>, window_params = [{transform_indices = @transform_0, window_bounds = array<i64: 64, 128>}, {pipeline_mode = #tpu.pipeline_mode<synchronous>, transform_indices = @transform_1, window_bounds = array<i64: 128, 128>}, {pipeline_mode = #tpu.pipeline_mode<synchronous>, transform_indices = @transform_2, window_bounds = array<i64: 128, 128>}, {pipeline_mode = #tpu.pipeline_mode<synchronous>, transform_indices = @transform_3, window_bounds = array<i64: 128, 128>}, {pipeline_mode = #tpu.pipeline_mode<synchronous>, transform_indices = @transform_4, window_bounds = array<i64: 3, 128>}, {transform_indices = @transform_5, window_bounds = array<i64: 64, 128>}]} {
    %c0 = arith.constant 0 : index
    %c0_0 = arith.constant 0 : index
    %0 = vector.load %arg1[%c0, %c0_0] : memref<64x128xbf16, #tpu.memory_space<vmem>>, vector<64x128xbf16>
    %c0_1 = arith.constant 0 : index
    %c0_2 = arith.constant 0 : index
    %1 = vector.load %arg2[%c0_1, %c0_2] : memref<128x128xbf16, #tpu.memory_space<vmem>>, vector<128x128xbf16>
    %c0_3 = arith.constant 0 : index
    %c0_4 = arith.constant 0 : index
    %2 = vector.load %arg5[%c0_3, %c0_4] : memref<3x128xf32, #tpu.memory_space<vmem>>, vector<1x128xf32>
    %cst = arith.constant dense<0.000000e+00> : vector<64x128xf32>
    %3 = tpu.matmul %0, %1, %cst {dimension_numbers = #tpu.dot_dimension_numbers<[1], [0], [0], [1], [0, 0, 1, 1], [], []>} : vector<64x128xbf16>, vector<128x128xbf16>, vector<64x128xf32> -> vector<64x128xf32>
    %4 = vector.broadcast %2 : vector<1x128xf32> to vector<64x128xf32>
    %5 = arith.addf %3, %4 : vector<64x128xf32>
    %cst_5 = arith.constant 0.000000e+00 : f32
    %6 = vector.broadcast %cst_5 : f32 to vector<64x128xf32>
    %7 = arith.maximumf %5, %6 : vector<64x128xf32>
    %8 = arith.truncf %7 : vector<64x128xf32> to vector<64x128xbf16>
    %c0_6 = arith.constant 0 : index
    %c0_7 = arith.constant 0 : index
    %9 = vector.load %arg3[%c0_6, %c0_7] : memref<128x128xbf16, #tpu.memory_space<vmem>>, vector<128x128xbf16>
    %c1 = arith.constant 1 : index
    %c0_8 = arith.constant 0 : index
    %10 = vector.load %arg5[%c1, %c0_8] : memref<3x128xf32, #tpu.memory_space<vmem>>, vector<1x128xf32>
    %cst_9 = arith.constant dense<0.000000e+00> : vector<64x128xf32>
    %11 = tpu.matmul %8, %9, %cst_9 {dimension_numbers = #tpu.dot_dimension_numbers<[1], [0], [0], [1], [0, 0, 1, 1], [], []>} : vector<64x128xbf16>, vector<128x128xbf16>, vector<64x128xf32> -> vector<64x128xf32>
    %12 = vector.broadcast %10 : vector<1x128xf32> to vector<64x128xf32>
    %13 = arith.addf %11, %12 : vector<64x128xf32>
    %cst_10 = arith.constant 0.000000e+00 : f32
    %14 = vector.broadcast %cst_10 : f32 to vector<64x128xf32>
    %15 = arith.maximumf %13, %14 : vector<64x128xf32>
    %16 = arith.truncf %15 : vector<64x128xf32> to vector<64x128xbf16>
    %c0_11 = arith.constant 0 : index
    %c0_12 = arith.constant 0 : index
    %17 = vector.load %arg4[%c0_11, %c0_12] : memref<128x128xbf16, #tpu.memory_space<vmem>>, vector<128x128xbf16>
    %c2 = arith.constant 2 : index
    %c0_13 = arith.constant 0 : index
    %18 = vector.load %arg5[%c2, %c0_13] : memref<3x128xf32, #tpu.memory_space<vmem>>, vector<1x128xf32>
    %cst_14 = arith.constant dense<0.000000e+00> : vector<64x128xf32>
    %19 = tpu.matmul %16, %17, %cst_14 {dimension_numbers = #tpu.dot_dimension_numbers<[1], [0], [0], [1], [0, 0, 1, 1], [], []>} : vector<64x128xbf16>, vector<128x128xbf16>, vector<64x128xf32> -> vector<64x128xf32>
    %20 = vector.broadcast %18 : vector<1x128xf32> to vector<64x128xf32>
    %21 = arith.addf %19, %20 : vector<64x128xf32>
    %c0_15 = arith.constant 0 : index
    %c0_16 = arith.constant 0 : index
    %22 = vector.load %arg6[%c0_15, %c0_16] : memref<64x128xf32, #tpu.memory_space<vmem>>, vector<64x128xf32>
    tpu.vector_store %arg6[%c0_15, %c0_16], %21 {strides = array<i32>} : memref<64x128xf32, #tpu.memory_space<vmem>>, vector<64x128xf32>,
    return
  }
  func.func @transform_0(%arg0: i32) -> (i32, i32) {
    %c0_i32 = arith.constant 0 : i32
    %c0_i32_0 = arith.constant 0 : i32
    return %arg0, %c0_i32 : i32, i32
  }
  func.func @transform_1(%arg0: i32) -> (i32, i32) {
    %c0_i32 = arith.constant 0 : i32
    %c0_i32_0 = arith.constant 0 : i32
    %c0_i32_1 = arith.constant 0 : i32
    return %c0_i32, %c0_i32_0 : i32, i32
  }
  func.func @transform_2(%arg0: i32) -> (i32, i32) {
    %c0_i32 = arith.constant 0 : i32
    %c0_i32_0 = arith.constant 0 : i32
    %c0_i32_1 = arith.constant 0 : i32
    return %c0_i32, %c0_i32_0 : i32, i32
  }
  func.func @transform_3(%arg0: i32) -> (i32, i32) {
    %c0_i32 = arith.constant 0 : i32
    %c0_i32_0 = arith.constant 0 : i32
    %c0_i32_1 = arith.constant 0 : i32
    return %c0_i32, %c0_i32_0 : i32, i32
  }
  func.func @transform_4(%arg0: i32) -> (i32, i32) {
    %c0_i32 = arith.constant 0 : i32
    %c0_i32_0 = arith.constant 0 : i32
    %c0_i32_1 = arith.constant 0 : i32
    return %c0_i32, %c0_i32_0 : i32, i32
  }
  func.func @transform_5(%arg0: i32) -> (i32, i32) {
    %c0_i32 = arith.constant 0 : i32
    %c0_i32_0 = arith.constant 0 : i32
    return %arg0, %c0_i32 : i32, i32
  }
}

module attributes {stable_mosaic.version = 11 : i64} {
  func.func @_mlp_kernel(%arg0: i32, %arg1: memref<64x128xbf16, #tpu.memory_space<vmem>>, %arg2: memref<128x128xbf16, #tpu.memory_space<vmem>>, %arg3: memref<128x128xbf16, #tpu.memory_space<vmem>>, %arg4: memref<128x128xbf16, #tpu.memory_space<vmem>>, %arg5: memref<3x128xf32, #tpu.memory_space<vmem>>, %arg6: memref<64x128xf32, #tpu.memory_space<vmem>>) attributes {dimension_semantics = [#tpu.dimension_semantics<parallel>], iteration_bounds = array<i64: 1>, scalar_prefetch = 0 : i64, scratch_operands = 0 : i64, tpu.core_type = #tpu.core_type<tc>, window_params = [{transform_indices = @transform_0, window_bounds = array<i64: 64, 128>}, {pipeline_mode = #tpu.pipeline_mode<synchronous>, transform_indices = @transform_1, window_bounds = array<i64: 128, 128>}, {pipeline_mode = #tpu.pipeline_mode<synchronous>, transform_indices = @transform_2, window_bounds = array<i64: 128, 128>}, {pipeline_mode = #tpu.pipeline_mode<synchronous>, transform_indices = @transform_3, window_bounds = array<i64: 128, 128>}, {pipeline_mode = #tpu.pipeline_mode<synchronous>, transform_indices = @transform_4, window_bounds = array<i64: 3, 128>}, {transform_indices = @transform_5, window_bounds = array<i64: 64, 128>}]} {
    %c0 = arith.constant 0 : index
    %c0_0 = arith.constant 0 : index
    %0 = vector.load %arg1[%c0, %c0_0] : memref<64x128xbf16, #tpu.memory_space<vmem>>, vector<64x128xbf16>
    %c0_1 = arith.constant 0 : index
    %c0_2 = arith.constant 0 : index
    %1 = vector.load %arg2[%c0_1, %c0_2] : memref<128x128xbf16, #tpu.memory_space<vmem>>, vector<128x128xbf16>
    %c0_3 = arith.constant 0 : index
    %c0_4 = arith.constant 0 : index
    %2 = vector.load %arg5[%c0_3, %c0_4] : memref<3x128xf32, #tpu.memory_space<vmem>>, vector<1x128xf32>
    %cst = arith.constant dense<0.000000e+00> : vector<64x128xf32>
    %3 = tpu.matmul %0, %1, %cst {dimension_numbers = #tpu.dot_dimension_numbers<[1], [0], [0], [1], [0, 0, 1, 1], [], []>} : vector<64x128xbf16>, vector<128x128xbf16>, vector<64x128xf32> -> vector<64x128xf32>
    %4 = vector.broadcast %2 : vector<1x128xf32> to vector<64x128xf32>
    %5 = arith.addf %3, %4 : vector<64x128xf32>
    %cst_5 = arith.constant 0.000000e+00 : f32
    %6 = vector.broadcast %cst_5 : f32 to vector<64x128xf32>
    %7 = arith.maximumf %5, %6 : vector<64x128xf32>
    %8 = arith.truncf %7 : vector<64x128xf32> to vector<64x128xbf16>
    %c0_6 = arith.constant 0 : index
    %c0_7 = arith.constant 0 : index
    %9 = vector.load %arg3[%c0_6, %c0_7] : memref<128x128xbf16, #tpu.memory_space<vmem>>, vector<128x128xbf16>
    %c1 = arith.constant 1 : index
    %c0_8 = arith.constant 0 : index
    %10 = vector.load %arg5[%c1, %c0_8] : memref<3x128xf32, #tpu.memory_space<vmem>>, vector<1x128xf32>
    %cst_9 = arith.constant dense<0.000000e+00> : vector<64x128xf32>
    %11 = tpu.matmul %8, %9, %cst_9 {dimension_numbers = #tpu.dot_dimension_numbers<[1], [0], [0], [1], [0, 0, 1, 1], [], []>} : vector<64x128xbf16>, vector<128x128xbf16>, vector<64x128xf32> -> vector<64x128xf32>
    %12 = vector.broadcast %10 : vector<1x128xf32> to vector<64x128xf32>
    %13 = arith.addf %11, %12 : vector<64x128xf32>
    %cst_10 = arith.constant 0.000000e+00 : f32
    %14 = vector.broadcast %cst_10 : f32 to vector<64x128xf32>
    %15 = arith.maximumf %13, %14 : vector<64x128xf32>
    %16 = arith.truncf %15 : vector<64x128xf32> to vector<64x128xbf16>
    %c0_11 = arith.constant 0 : index
    %c0_12 = arith.constant 0 : index
    %17 = vector.load %arg4[%c0_11, %c0_12] : memref<128x128xbf16, #tpu.memory_space<vmem>>, vector<128x128xbf16>
    %c2 = arith.constant 2 : index
    %c0_13 = arith.constant 0 : index
    %18 = vector.load %arg5[%c2, %c0_13] : memref<3x128xf32, #tpu.memory_space<vmem>>, vector<1x128xf32>
    %cst_14 = arith.constant dense<0.000000e+00> : vector<64x128xf32>
    %19 = tpu.matmul %16, %17, %cst_14 {dimension_numbers = #tpu.dot_dimension_numbers<[1], [0], [0], [1], [0, 0, 1, 1], [], []>} : vector<64x128xbf16>, vector<128x128xbf16>, vector<64x128xf32> -> vector<64x128xf32>
    %20 = vector.broadcast %18 : vector<1x128xf32> to vector<64x128xf32>
    %21 = arith.addf %19, %20 : vector<64x128xf32>
    %c0_15 = arith.constant 0 : index
    %c0_16 = arith.constant 0 : index
    %22 = vector.load %arg6[%c0_15, %c0_16] : memref<64x128xf32, #tpu.memory_space<vmem>>, vector<64x128xf32>
    tpu.vector_store %arg6[%c0_15, %c0_16], %21 {strides = array<i32>} : memref<64x128xf32, #tpu.memory_space<vmem>>, vector<64x128xf32>,
    return
  }
  func.func @transform_0(%arg0: i32) -> (i32, i32) {
    %c0_i32 = arith.constant 0 : i32
    %c0_i32_0 = arith.constant 0 : i32
    return %arg0, %c0_i32 : i32, i32
  }
  func.func @transform_1(%arg0: i32) -> (i32, i32) {
    %c0_i32 = arith.constant 0 : i32
    %c0_i32_0 = arith.constant 0 : i32
    %c0_i32_1 = arith.constant 0 : i32
    return %c0_i32, %c0_i32_0 : i32, i32
  }
  func.func @transform_2(%arg0: i32) -> (i32, i32) {
    %c0_i32 = arith.constant 0 : i32
    %c0_i32_0 = arith.constant 0 : i32
    %c0_i32_1 = arith.constant 0 : i32
    return %c0_i32, %c0_i32_0 : i32, i32
  }
  func.func @transform_3(%arg0: i32) -> (i32, i32) {
    %c0_i32 = arith.constant 0 : i32
    %c0_i32_0 = arith.constant 0 : i32
    %c0_i32_1 = arith.constant 0 : i32
    return %c0_i32, %c0_i32_0 : i32, i32
  }
  func.func @transform_4(%arg0: i32) -> (i32, i32) {
    %c0_i32 = arith.constant 0 : i32
    %c0_i32_0 = arith.constant 0 : i32
    %c0_i32_1 = arith.constant 0 : i32
    return %c0_i32, %c0_i32_0 : i32, i32
  }
  func.func @transform_5(%arg0: i32) -> (i32, i32) {
    %c0_i32 = arith.constant 0 : i32
    %c0_i32_0 = arith.constant 0 : i32
    return %arg0, %c0_i32 : i32, i32
  }
}

</mosaic_0001>

<bundles_post_ra>
// kernel: tpu_custom_call.1
= control target key start
LH: loop header
LB: loop body
LE: loop exit
PB: predicated region body
PF: predicated region fallthrough
CT: control target
= control target key end

     0   :  { %10 = vsyncpa [#allocation3], 0  ;;  %s1006_s0 = inlined_call_operand.hbm [shape: bf16[64,128], index: 0, kind: input, shape index: {}]   ;;  %s1007_s1 = inlined_call_operand.hbm [shape: bf16[128,128], index: 1, kind: input, shape index: {}]   ;;  %s1008_s2 = inlined_call_operand.hbm [shape: bf16[128,128], index: 2, kind: input, shape index: {}]   ;;  %s1009_s3 = inlined_call_operand.hbm [shape: bf16[128,128], index: 3, kind: input, shape index: {}]   ;;  %s1010_s4 = inlined_call_operand.vmem [shape: f32[3,128], index: 4, kind: input, shape index: {}]   ;;  %s1011_s5 = inlined_call_operand.hbm [shape: f32[64,128], index: 5, kind: output, shape index: {}]  }
   0x1   :  { %11 = vsyncpa [#allocation6], 0 }
   0x2   :  { %12 = vsyncpa [#allocation9], 0 }
   0x3   :  { %13 = vsyncpa [#allocation4], 0  ;;  %s872_s18 = smov [#allocation5]   ;;  %s873_s20 = smov [#allocation2]  }
   0x4   :  { %s31_s19 = sshll.u32 %s872_s18, 4  ;;  %s19_s21 = sshll.u32 %s873_s20, 4  ;;  %s32_s19 = int_to_ptr.vmem [resolvable:$true] %s31_s19  ;;  %s911_s21 = int_to_ptr.vmem [resolvable:$true] %s19_s21 }
   0x5   :  { %s754_s24 = scalar_lea.hbm %s1007_s1, 1024 }
   0x6   :  { %p755_p0 = scmp.ne.s32.totalorder %s1007_s1, %s754_s24  ;;  %p758_p1 = scmp.lt.u32.totalorder %s754_s24, %s1007_s1 }
   0x8   :  { %p760_p2 = pnand %p758_p1, %p755_p0 }
   0xa   :  { %763 = shalt.err (!%p760_p2)
}
   0xb   :  { %s764_s29 = scalar_lea.vmem %s32_s19, 1024  ;;  %p769_p4 = scmp.lt.s32.totalorder %s32_s19, %s32_s19 }
   0xc   :  { %p765_p3 = scmp.ne.s32.totalorder %s32_s19, %s764_s29  ;;  %p770_p5 = scmp.lt.s32.totalorder %s764_s29, %s764_s29 }
   0xe   :  { %p771_p6 = por %p770_p5, %p769_p4 }
  0x10   :  { %p772_p7 = pnand %p771_p6, %p765_p3 }
  0x12   :  { %775 = shalt.err (!%p772_p7)
}
  0x13   :  { %s874_s30 = smov 64   ;;  %s875_s6 = smov 4  }
  0x14   :  { %37 = dma.hbm_to_vmem [thread:$0]  %s1007_s1, 1024, %s32_s19, [#allocation6], %s874_s30, %s874_s30, %s875_s6  }
  0x15   :  { %s776_s11 = scalar_lea.hbm %s1006_s0, 512 }
  0x16   :  { %p777_p8 = scmp.ne.s32.totalorder %s1006_s0, %s776_s11  ;;  %p780_p9 = scmp.lt.u32.totalorder %s776_s11, %s1006_s0 }
  0x18   :  { %p782_p10 = pnand %p780_p9, %p777_p8 }
  0x1a   :  { %785 = shalt.err (!%p782_p10)
}
  0x1b   :  { %s786_s16 = scalar_lea.vmem %s911_s21, 512  ;;  %p791_p12 = scmp.lt.s32.totalorder %s911_s21, %s911_s21 }
  0x1c   :  { %p787_p11 = scmp.ne.s32.totalorder %s911_s21, %s786_s16  ;;  %p792_p13 = scmp.lt.s32.totalorder %s786_s16, %s786_s16 }
  0x1e   :  { %p793_p0 = por %p792_p13, %p791_p12 }
  0x20   :  { %p794_p1 = pnand %p793_p0, %p787_p11 }
  0x22   :  { %797 = shalt.err (!%p794_p1)
}
  0x23   :  { %25 = dma.hbm_to_vmem [thread:$0]  %s1006_s0, 512, %s911_s21, [#allocation3], %s874_s30, %s874_s30, %s875_s6  }
  0x24   :  { %s876_s18 = smov [#allocation7]   ;;  %s877_s20 = smov [#allocation8]  }
  0x25   :  { %s43_s19 = sshll.u32 %s876_s18, 4  ;;  %s55_s22 = sshll.u32 %s877_s20, 4  ;;  %s44_s19 = int_to_ptr.vmem [resolvable:$true] %s43_s19  ;;  %s948_s22 = int_to_ptr.vmem [resolvable:$true] %s55_s22 }
  0x26   :  { %s798_s25 = scalar_lea.hbm %s1008_s2, 1024 }
  0x27   :  { %p799_p2 = scmp.ne.s32.totalorder %s1008_s2, %s798_s25  ;;  %p802_p3 = scmp.lt.u32.totalorder %s798_s25, %s1008_s2 }
  0x29   :  { %p804_p4 = pnand %p802_p3, %p799_p2 }
  0x2b   :  { %807 = shalt.err (!%p804_p4)
}
  0x2c   :  { %s808_s0 = scalar_lea.vmem %s44_s19, 1024  ;;  %p813_p6 = scmp.lt.s32.totalorder %s44_s19, %s44_s19 }
  0x2d   :  { %p809_p5 = scmp.ne.s32.totalorder %s44_s19, %s808_s0  ;;  %p814_p7 = scmp.lt.s32.totalorder %s808_s0, %s808_s0 }
  0x2f   :  { %p815_p8 = por %p814_p7, %p813_p6 }
  0x31   :  { %p816_p9 = pnand %p815_p8, %p809_p5 }
  0x33   :  { %819 = shalt.err (!%p816_p9)
}
  0x34   :  { %49 = dma.hbm_to_vmem [thread:$0]  %s1008_s2, 1024, %s44_s19, [#allocation6], %s874_s30, %s874_s30, %s875_s6  }
  0x35   :  { %s820_s10 = scalar_lea.hbm %s1009_s3, 1024 }
  0x36   :  { %p821_p10 = scmp.ne.s32.totalorder %s1009_s3, %s820_s10  ;;  %p824_p11 = scmp.lt.u32.totalorder %s820_s10, %s1009_s3 }
  0x38   :  { %p826_p12 = pnand %p824_p11, %p821_p10 }
  0x3a   :  { %829 = shalt.err (!%p826_p12)
}
  0x3b   :  { %s830_s15 = scalar_lea.vmem %s948_s22, 1024  ;;  %p835_p0 = scmp.lt.s32.totalorder %s948_s22, %s948_s22 }
  0x3c   :  { %p831_p13 = scmp.ne.s32.totalorder %s948_s22, %s830_s15  ;;  %p836_p1 = scmp.lt.s32.totalorder %s830_s15, %s830_s15 }
  0x3e   :  { %p837_p2 = por %p836_p1, %p835_p0 }
  0x40   :  { %p838_p3 = pnand %p837_p2, %p831_p13 }
  0x42   :  { %841 = shalt.err (!%p838_p3)
}
  0x43   :  { %61 = dma.hbm_to_vmem [thread:$0]  %s1009_s3, 1024, %s948_s22, [#allocation9], %s874_s30, %s874_s30, %s875_s6  }
  0x44   :  { %864 = dma.done.wait [#allocation3], 512  }
  0x45   :  { %865 = vsyncadd [#allocation3], 4294966784 }
  0x46   :  { %866 = dma.done.wait [#allocation6], 2048  }
  0x47   :  { %867 = vsyncadd [#allocation6], 4294965248 }
  0x48   :  { %868 = dma.done.wait [#allocation9], 1024  }
  0x49   :  { %869 = vsyncadd [#allocation9], 4294966272  ;;  %v726_v0 = vld [vmem:[#allocation5] sm:$0xff]   ;;  %v727_v1 = vld [vmem:[#allocation5 + $0x8] sm:$0xff]   ;;  %s878_s19 = smov [#allocation10]  }
  0x4a   :  { %629 = vmatprep.subr.bf16.mxu0 %v726_v0  ;;  %v728_v2 = vld [vmem:[#allocation5 + $0x10] sm:$0xff]   ;;  %v729_v3 = vld [vmem:[#allocation5 + $0x18] sm:$0xff]   ;;  %v734_v4 = vld [vmem:[#allocation2] sm:$0xff]   ;;  %s548_s20 = sshll.u32 %s878_s19, 4  ;;  %s549_s20 = int_to_ptr.vmem [resolvable:$true] %s548_s20 }
  0x4b   :  { %630 = vmatpush3.bf16.msra.mxu0 %v726_v0  ;;  %645 = vmatprep.mubr.bf16.mxu0 %v734_v4  ;;  %v730_v5 = vld [vmem:[#allocation5 + $0x20] sm:$0xff]   ;;  %v739_v7 = vld [vmem:[#allocation7 + $0x8] sm:$0xff]   ;;  %v740_v9 = vld [vmem:[#allocation7 + $0x10] sm:$0xff]   ;;  %p847_p5 = scmp.lt.s32.totalorder %s549_s20, %s549_s20 }
  0x4c   :  { %631 = vmatprep.subr.bf16.mxu0 %v727_v1  ;;  %v738_v6 = vld [vmem:[#allocation7] sm:$0xff]   ;;  %v731_v8 = vld [vmem:[#allocation5 + $0x28] sm:$0xff]   ;;  %v732_v10 = vld [vmem:[#allocation5 + $0x30] sm:$0xff]  }
  0x4d   :  { %653 = vmatprep.subr.bf16.mxu1 %v738_v6  ;;  %v741_v11 = vld [vmem:[#allocation7 + $0x18] sm:$0xff]   ;;  %v742_v13 = vld [vmem:[#allocation7 + $0x20] sm:$0xff]   ;;  %v743_v14 = vld [vmem:[#allocation7 + $0x28] sm:$0xff]  }
  0x4e   :  { %654 = vmatpush3.bf16.msra.mxu1 %v738_v6  ;;  %v733_v12 = vld [vmem:[#allocation5 + $0x38] sm:$0xff]   ;;  %v735_v15 = vld [vmem:[#allocation2 + $0x8] sm:$0xff]   ;;  %v736_v16 = vld [vmem:[#allocation2 + $0x10] sm:$0xff]  }
  0x4f   :  { %632 = vmatpush3.bf16.msra.mxu0 %v727_v1  ;;  %655 = vmatprep.subr.bf16.mxu1 %v739_v7  ;;  %v737_v17 = vld [vmem:[#allocation2 + $0x18] sm:$0xff]   ;;  %v744_v18 = vld [vmem:[#allocation7 + $0x30] sm:$0xff]   ;;  %v746_v20 = vld [vmem:[#allocation8] sm:$0xff]  }
  0x50   :  { %633 = vmatprep.subr.bf16.mxu0 %v728_v2  ;;  %v745_v19 = vld [vmem:[#allocation7 + $0x38] sm:$0xff]   ;;  %v747_v21 = vld [vmem:[#allocation8 + $0x8] sm:$0xff]   ;;  %v748_v22 = vld [vmem:[#allocation8 + $0x10] sm:$0xff]  }
  0x51   :  { %v749_v23 = vld [vmem:[#allocation8 + $0x18] sm:$0xff]   ;;  %v750_v24 = vld [vmem:[#allocation8 + $0x20] sm:$0xff]   ;;  %v751_v25 = vld [vmem:[#allocation8 + $0x28] sm:$0xff]  }
  0x52   :  { %656 = vmatpush3.bf16.msra.mxu1 %v739_v7  ;;  %v562_v26 = vld [vmem:[%s1010_s4] ss:$0 sm:$0xff]  ;;  %v752_v55 = vld [vmem:[#allocation8 + $0x30] sm:$0xff]   ;;  %v753_v56 = vld [vmem:[#allocation8 + $0x38] sm:$0xff]  }
  0x53   :  { %634 = vmatpush3.bf16.msra.mxu0 %v728_v2  ;;  %657 = vmatprep.subr.bf16.mxu1 %v740_v9  ;;  %v575_v57 = vld [vmem:[%s1010_s4 + $0x1] ss:$0 sm:$0xff] }
  0x54   :  { %635 = vmatprep.subr.bf16.mxu0 %v729_v3 }
  0x56   :  { %658 = vmatpush3.bf16.msra.mxu1 %v740_v9 }
  0x57   :  { %636 = vmatpush3.bf16.msra.mxu0 %v729_v3  ;;  %659 = vmatprep.subr.bf16.mxu1 %v741_v11 }
  0x58   :  { %637 = vmatprep.subr.bf16.mxu0 %v730_v5 }
  0x5a   :  { %660 = vmatpush3.bf16.msra.mxu1 %v741_v11 }
  0x5b   :  { %638 = vmatpush3.bf16.msra.mxu0 %v730_v5  ;;  %661 = vmatprep.subr.bf16.mxu1 %v742_v13 }
  0x5c   :  { %639 = vmatprep.subr.bf16.mxu0 %v731_v8 }
  0x5e   :  { %662 = vmatpush3.bf16.msra.mxu1 %v742_v13 }
  0x5f   :  { %640 = vmatpush3.bf16.msra.mxu0 %v731_v8  ;;  %663 = vmatprep.subr.bf16.mxu1 %v743_v14 }
  0x60   :  { %641 = vmatprep.subr.bf16.mxu0 %v732_v10 }
  0x62   :  { %664 = vmatpush3.bf16.msra.mxu1 %v743_v14 }
  0x63   :  { %642 = vmatpush3.bf16.msra.mxu0 %v732_v10  ;;  %665 = vmatprep.subr.bf16.mxu1 %v744_v18 }
  0x64   :  { %643 = vmatprep.subr.bf16.mxu0 %v733_v12 }
  0x66   :  { %666 = vmatpush3.bf16.msra.mxu1 %v744_v18 }
  0x67   :  { %644 = vmatpush3.bf16.msra.mxu0 %v733_v12  ;;  %667 = vmatprep.subr.bf16.mxu1 %v745_v19 }
  0x68   :  { %677 = vmatprep.subr.bf16.mxu0 %v746_v20 }
  0x6a   :  { %646 = vmatmul.mubr.bf16.vlgmr.msra.gmra.mrb[0].mxu0 %v735_v15  ;;  %668 = vmatpush3.bf16.msra.mxu1 %v745_v19 }
  0x6b   :  { %649 = vmatprep.mubr.bf16.mxu0 %v736_v16  ;;  %701 = vmatprep.subr.bf16.mxu1 %v746_v20 }
  0x6c   :  { %678 = vmatpush3.bf16.msra.mxu0 %v746_v20 }
  0x6d   :  { %679 = vmatprep.subr.bf16.mxu0 %v747_v21 }
  0x70   :  { %680 = vmatpush3.bf16.msra.mxu0 %v747_v21 }
  0x71   :  { %681 = vmatprep.subr.bf16.mxu0 %v748_v22 }
  0x72   :  { %650 = vmatmul.mubr.bf16.gmra.mrb[4].mxu0 %v737_v17 }
  0x74   :  { %682 = vmatpush3.bf16.msra.mxu0 %v748_v22 }
  0x75   :  { %683 = vmatprep.subr.bf16.mxu0 %v749_v23 }
  0x78   :  { %684 = vmatpush3.bf16.msra.mxu0 %v749_v23 }
  0x79   :  { %685 = vmatprep.subr.bf16.mxu0 %v750_v24 }
  0x7c   :  { %686 = vmatpush3.bf16.msra.mxu0 %v750_v24 }
  0x7d   :  { %687 = vmatprep.subr.bf16.mxu0 %v751_v25 }
  0x80   :  { %688 = vmatpush3.bf16.msra.mxu0 %v751_v25 }
  0x81   :  { %689 = vmatprep.subr.bf16.mxu0 %v752_v55 }
  0x84   :  { %690 = vmatpush3.bf16.msra.mxu0 %v752_v55 }
  0x85   :  { %691 = vmatprep.subr.bf16.mxu0 %v753_v56 }
  0x88   :  { %692 = vmatpush3.bf16.msra.mxu0 %v753_v56 }
 0x13d   :  { %v647_v27 = vpop.f32.mrb[0].mxu0 }
 0x13e   :  { %v221_v28 = vadd.f32 %v647_v27, %v562_v26  ;;  %v212_v29 = vpop.f32.mrb[1].mxu0 }
 0x13f   :  { %v213_v30 = vadd.f32 %v562_v26, %v212_v29  ;;  %v648_v31 = vpop.f32.mrb[2].mxu0 }
 0x140   :  { %v224_v32 = vadd.f32 %v648_v31, %v562_v26  ;;  %v215_v33 = vpop.f32.mrb[3].mxu0  ;;  %v245_v35 = vmax.f32 %v221_v28, 0.0 }
 0x141   :  { %v216_v34 = vadd.f32 %v562_v26, %v215_v33  ;;  %v243_v37 = vmax.f32 %v213_v30, 0.0 }
 0x142   :  { %v246_v36 = vmax.f32 %v224_v32, 0.0 }
 0x143   :  { %v244_v38 = vmax.f32 %v216_v34, 0.0 }
 0x144   :  { %v252_v39 = vpack.c.bf16 %v246_v36, %v245_v35 }
 0x145   :  { %v651_v40 = vpop.f32.mrb[4].mxu0  ;;  %v251_v41 = vpack.c.bf16 %v244_v38, %v243_v37 }
 0x146   :  { %v237_v42 = vadd.f32 %v651_v40, %v562_v26  ;;  %v228_v43 = vpop.f32.mrb[5].mxu0 }
 0x147   :  { %v229_v44 = vadd.f32 %v562_v26, %v228_v43  ;;  %v652_v45 = vpop.f32.mrb[6].mxu0  ;;  %669 = vmatprep.mubr.bf16.mxu1 %v251_v41 }
 0x148   :  { %v240_v46 = vadd.f32 %v652_v45, %v562_v26  ;;  %v231_v47 = vpop.f32.mrb[7].mxu0  ;;  %670 = vmatmul.mubr.bf16.vlgmr.msra.gmra.mrb[0].mxu1 %v252_v39  ;;  %v249_v49 = vmax.f32 %v237_v42, 0.0 }
 0x149   :  { %v232_v48 = vadd.f32 %v562_v26, %v231_v47  ;;  %709 = vmatpush3.bf16.msra.mxu1 %v746_v20  ;;  %v247_v51 = vmax.f32 %v229_v44, 0.0 }
 0x14a   :  { %v250_v50 = vmax.f32 %v240_v46, 0.0  ;;  %702 = vmatprep.subr.bf16.mxu1 %v747_v21 }
 0x14b   :  { %v248_v52 = vmax.f32 %v232_v48, 0.0 }
 0x14c   :  { %v254_v53 = vpack.c.bf16 %v250_v50, %v249_v49 }
 0x14d   :  { %v253_v54 = vpack.c.bf16 %v248_v52, %v247_v51  ;;  %710 = vmatpush3.bf16.msra.mxu1 %v747_v21 }
 0x14e   :  { %703 = vmatprep.subr.bf16.mxu1 %v748_v22 }
 0x14f   :  { %673 = vmatprep.mubr.bf16.mxu1 %v253_v54 }
 0x150   :  { %674 = vmatmul.mubr.bf16.gmra.mrb[4].mxu1 %v254_v53 }
 0x151   :  { %711 = vmatpush3.bf16.msra.mxu1 %v748_v22  ;;  %v584_v22 = vld [vmem:[%s1010_s4 + $0x2] ss:$0 sm:$0xff]  ;;  %s842_s4 = scalar_lea.vmem %s549_s20, 1024 }
 0x152   :  { %704 = vmatprep.subr.bf16.mxu1 %v749_v23  ;;  %p843_p4 = scmp.ne.s32.totalorder %s549_s20, %s842_s4  ;;  %p848_p6 = scmp.lt.s32.totalorder %s842_s4, %s842_s4 }
 0x154   :  { %p849_p7 = por %p848_p6, %p847_p5 }
 0x155   :  { %712 = vmatpush3.bf16.msra.mxu1 %v749_v23 }
 0x156   :  { %705 = vmatprep.subr.bf16.mxu1 %v750_v24  ;;  %p850_p8 = pnand %p849_p7, %p843_p4 }
 0x159   :  { %713 = vmatpush3.bf16.msra.mxu1 %v750_v24 }
 0x15a   :  { %706 = vmatprep.subr.bf16.mxu1 %v751_v25 }
 0x15d   :  { %714 = vmatpush3.bf16.msra.mxu1 %v751_v25 }
 0x15e   :  { %707 = vmatprep.subr.bf16.mxu1 %v752_v55 }
 0x161   :  { %715 = vmatpush3.bf16.msra.mxu1 %v752_v55 }
 0x162   :  { %708 = vmatprep.subr.bf16.mxu1 %v753_v56 }
 0x165   :  { %716 = vmatpush3.bf16.msra.mxu1 %v753_v56 }
 0x21b   :  { %v671_v58 = vpop.f32.mrb[0].mxu1 }
 0x21c   :  { %v367_v59 = vadd.f32 %v671_v58, %v575_v57  ;;  %v358_v60 = vpop.f32.mrb[1].mxu1 }
 0x21d   :  { %v359_v61 = vadd.f32 %v575_v57, %v358_v60  ;;  %v672_v62 = vpop.f32.mrb[2].mxu1 }
 0x21e   :  { %v370_v63 = vadd.f32 %v672_v62, %v575_v57  ;;  %v361_v0 = vpop.f32.mrb[3].mxu1  ;;  %v391_v2 = vmax.f32 %v367_v59, 0.0 }
 0x21f   :  { %v362_v1 = vadd.f32 %v575_v57, %v361_v0  ;;  %v389_v4 = vmax.f32 %v359_v61, 0.0 }
 0x220   :  { %v392_v3 = vmax.f32 %v370_v63, 0.0 }
 0x221   :  { %v390_v5 = vmax.f32 %v362_v1, 0.0 }
 0x222   :  { %v398_v6 = vpack.c.bf16 %v392_v3, %v391_v2 }
 0x223   :  { %v397_v7 = vpack.c.bf16 %v390_v5, %v389_v4  ;;  %v675_v8 = vpop.f32.mrb[4].mxu1 }
 0x224   :  { %v383_v9 = vadd.f32 %v675_v8, %v575_v57  ;;  %v374_v10 = vpop.f32.mrb[5].mxu1 }
 0x225   :  { %v375_v11 = vadd.f32 %v575_v57, %v374_v10  ;;  %v676_v12 = vpop.f32.mrb[6].mxu1  ;;  %693 = vmatprep.mubr.bf16.mxu0 %v397_v7 }
 0x226   :  { %v386_v13 = vadd.f32 %v676_v12, %v575_v57  ;;  %v377_v14 = vpop.f32.mrb[7].mxu1  ;;  %694 = vmatmul.mubr.bf16.vlgmr.msra.gmra.mrb[8].mxu0 %v398_v6  ;;  %v395_v16 = vmax.f32 %v383_v9, 0.0 }
 0x227   :  { %v378_v15 = vadd.f32 %v575_v57, %v377_v14  ;;  %v393_v18 = vmax.f32 %v375_v11, 0.0 }
 0x228   :  { %v396_v17 = vmax.f32 %v386_v13, 0.0 }
 0x229   :  { %v394_v19 = vmax.f32 %v378_v15, 0.0 }
 0x22a   :  { %v400_v20 = vpack.c.bf16 %v396_v17, %v395_v16 }
 0x22b   :  { %v399_v21 = vpack.c.bf16 %v394_v19, %v393_v18 }
 0x22d   :  { %697 = vmatprep.mubr.bf16.mxu1 %v399_v21 }
 0x22e   :  { %698 = vmatmul.mubr.bf16.vlgmr.msra.gmra.mrb[8].mxu1 %v400_v20 }
 0x2f9   :  { %v695_v23 = vpop.f32.mrb[8].mxu0 }
 0x2fa   :  { %v513_v24 = vadd.f32 %v695_v23, %v584_v22  ;;  %v504_v25 = vpop.f32.mrb[9].mxu0 }
 0x2fb   :  { %v505_v26 = vadd.f32 %v584_v22, %v504_v25  ;;  %v696_v27 = vpop.f32.mrb[10].mxu0 }
 0x2fc   :  { %537 = vst [vmem:[#allocation10 + $0x10] sm:$0xff] %v513_v24  ;;  %v516_v28 = vadd.f32 %v696_v27, %v584_v22  ;;  %v507_v29 = vpop.f32.mrb[11].mxu0 }
 0x2fd   :  { %535 = vst [vmem:[#allocation10] sm:$0xff] %v505_v26  ;;  %v508_v30 = vadd.f32 %v584_v22, %v507_v29 }
 0x2fe   :  { %538 = vst [vmem:[#allocation10 + $0x18] sm:$0xff] %v516_v28 }
 0x2ff   :  { %536 = vst [vmem:[#allocation10 + $0x8] sm:$0xff] %v508_v30 }
 0x301   :  { %v699_v31 = vpop.f32.mrb[8].mxu1 }
 0x302   :  { %v529_v32 = vadd.f32 %v699_v31, %v584_v22  ;;  %v520_v33 = vpop.f32.mrb[9].mxu1 }
 0x303   :  { %v521_v34 = vadd.f32 %v584_v22, %v520_v33  ;;  %v700_v35 = vpop.f32.mrb[10].mxu1 }
 0x304   :  { %541 = vst [vmem:[#allocation10 + $0x30] sm:$0xff] %v529_v32  ;;  %v532_v36 = vadd.f32 %v700_v35, %v584_v22  ;;  %v523_v37 = vpop.f32.mrb[11].mxu1 }
 0x305   :  { %539 = vst [vmem:[#allocation10 + $0x20] sm:$0xff] %v521_v34  ;;  %v524_v38 = vadd.f32 %v584_v22, %v523_v37 }
 0x306   :  { %542 = vst [vmem:[#allocation10 + $0x38] sm:$0xff] %v532_v36 }
 0x307   :  { %540 = vst [vmem:[#allocation10 + $0x28] sm:$0xff] %v524_v38 }
 0x308   :  { %853 = shalt.err (!%p850_p8)
}
 0x309   :  { %s854_s24 = scalar_lea.hbm %s1011_s5, 1024 }
 0x30a   :  { %p855_p9 = scmp.ne.s32.totalorder %s1011_s5, %s854_s24  ;;  %p858_p10 = scmp.lt.u32.totalorder %s854_s24, %s1011_s5 }
 0x30c   :  { %p860_p11 = pnand %p858_p10, %p855_p9 }
 0x30e   :  { %863 = shalt.err (!%p860_p11)
}
 0x30f   :  { %s879_s29 = smov 128   ;;  %s880_s0 = smov 8  }
 0x310   :  { %554 = dma.vmem_to_hbm [thread:$0]  %s549_s20, 1024, %s1011_s5, [#allocation4], %s879_s29, %s879_s29, %s880_s0  }
 0x311   :  { %870 = dma.done.wait [#allocation4], 1024  }
 0x312   :  { %871 = vsyncadd [#allocation4], 4294966272 }
 0x313   :  { %558 = vsyncpa [#allocation3], 1 }
 0x314   :  { %559 = vsyncpa [#allocation6], 1 }
 0x315   :  { %560 = vsyncpa [#allocation9], 1 }
 0x316   :  { %561 = vsyncpa [#allocation4], 1 }

// kernel: tpu_custom_call.1
= control target key start
LH: loop header
LB: loop body
LE: loop exit
PB: predicated region body
PF: predicated region fallthrough
CT: control target
= control target key end

     0   :  { %10 = vsyncpa [#allocation3], 0  ;;  %s1006_s0 = inlined_call_operand.hbm [shape: bf16[64,128], index: 0, kind: input, shape index: {}]   ;;  %s1007_s1 = inlined_call_operand.hbm [shape: bf16[128,128], index: 1, kind: input, shape index: {}]   ;;  %s1008_s2 = inlined_call_operand.hbm [shape: bf16[128,128], index: 2, kind: input, shape index: {}]   ;;  %s1009_s3 = inlined_call_operand.hbm [shape: bf16[128,128], index: 3, kind: input, shape index: {}]   ;;  %s1010_s4 = inlined_call_operand.vmem [shape: f32[3,128], index: 4, kind: input, shape index: {}]   ;;  %s1011_s5 = inlined_call_operand.hbm [shape: f32[64,128], index: 5, kind: output, shape index: {}]  }
   0x1   :  { %11 = vsyncpa [#allocation6], 0 }
   0x2   :  { %12 = vsyncpa [#allocation9], 0 }
   0x3   :  { %13 = vsyncpa [#allocation4], 0  ;;  %s872_s18 = smov [#allocation5]   ;;  %s873_s20 = smov [#allocation2]  }
   0x4   :  { %s31_s19 = sshll.u32 %s872_s18, 4  ;;  %s19_s21 = sshll.u32 %s873_s20, 4  ;;  %s32_s19 = int_to_ptr.vmem [resolvable:$true] %s31_s19  ;;  %s911_s21 = int_to_ptr.vmem [resolvable:$true] %s19_s21 }
   0x5   :  { %s754_s24 = scalar_lea.hbm %s1007_s1, 1024 }
   0x6   :  { %p755_p0 = scmp.ne.s32.totalorder %s1007_s1, %s754_s24  ;;  %p758_p1 = scmp.lt.u32.totalorder %s754_s24, %s1007_s1 }
   0x8   :  { %p760_p2 = pnand %p758_p1, %p755_p0 }
   0xa   :  { %763 = shalt.err (!%p760_p2)
}
   0xb   :  { %s764_s29 = scalar_lea.vmem %s32_s19, 1024  ;;  %p769_p4 = scmp.lt.s32.totalorder %s32_s19, %s32_s19 }
   0xc   :  { %p765_p3 = scmp.ne.s32.totalorder %s32_s19, %s764_s29  ;;  %p770_p5 = scmp.lt.s32.totalorder %s764_s29, %s764_s29 }
   0xe   :  { %p771_p6 = por %p770_p5, %p769_p4 }
  0x10   :  { %p772_p7 = pnand %p771_p6, %p765_p3 }
  0x12   :  { %775 = shalt.err (!%p772_p7)
}
  0x13   :  { %s874_s30 = smov 64   ;;  %s875_s6 = smov 4  }
  0x14   :  { %37 = dma.hbm_to_vmem [thread:$0]  %s1007_s1, 1024, %s32_s19, [#allocation6], %s874_s30, %s874_s30, %s875_s6  }
  0x15   :  { %s776_s11 = scalar_lea.hbm %s1006_s0, 512 }
  0x16   :  { %p777_p8 = scmp.ne.s32.totalorder %s1006_s0, %s776_s11  ;;  %p780_p9 = scmp.lt.u32.totalorder %s776_s11, %s1006_s0 }
  0x18   :  { %p782_p10 = pnand %p780_p9, %p777_p8 }
  0x1a   :  { %785 = shalt.err (!%p782_p10)
}
  0x1b   :  { %s786_s16 = scalar_lea.vmem %s911_s21, 512  ;;  %p791_p12 = scmp.lt.s32.totalorder %s911_s21, %s911_s21 }
  0x1c   :  { %p787_p11 = scmp.ne.s32.totalorder %s911_s21, %s786_s16  ;;  %p792_p13 = scmp.lt.s32.totalorder %s786_s16, %s786_s16 }
  0x1e   :  { %p793_p0 = por %p792_p13, %p791_p12 }
  0x20   :  { %p794_p1 = pnand %p793_p0, %p787_p11 }
  0x22   :  { %797 = shalt.err (!%p794_p1)
}
  0x23   :  { %25 = dma.hbm_to_vmem [thread:$0]  %s1006_s0, 512, %s911_s21, [#allocation3], %s874_s30, %s874_s30, %s875_s6  }
  0x24   :  { %s876_s18 = smov [#allocation7]   ;;  %s877_s20 = smov [#allocation8]  }
  0x25   :  { %s43_s19 = sshll.u32 %s876_s18, 4  ;;  %s55_s22 = sshll.u32 %s877_s20, 4  ;;  %s44_s19 = int_to_ptr.vmem [resolvable:$true] %s43_s19  ;;  %s948_s22 = int_to_ptr.vmem [resolvable:$true] %s55_s22 }
  0x26   :  { %s798_s25 = scalar_lea.hbm %s1008_s2, 1024 }
  0x27   :  { %p799_p2 = scmp.ne.s32.totalorder %s1008_s2, %s798_s25  ;;  %p802_p3 = scmp.lt.u32.totalorder %s798_s25, %s1008_s2 }
  0x29   :  { %p804_p4 = pnand %p802_p3, %p799_p2 }
  0x2b   :  { %807 = shalt.err (!%p804_p4)
}
  0x2c   :  { %s808_s0 = scalar_lea.vmem %s44_s19, 1024  ;;  %p813_p6 = scmp.lt.s32.totalorder %s44_s19, %s44_s19 }
  0x2d   :  { %p809_p5 = scmp.ne.s32.totalorder %s44_s19, %s808_s0  ;;  %p814_p7 = scmp.lt.s32.totalorder %s808_s0, %s808_s0 }
  0x2f   :  { %p815_p8 = por %p814_p7, %p813_p6 }
  0x31   :  { %p816_p9 = pnand %p815_p8, %p809_p5 }
  0x33   :  { %819 = shalt.err (!%p816_p9)
}
  0x34   :  { %49 = dma.hbm_to_vmem [thread:$0]  %s1008_s2, 1024, %s44_s19, [#allocation6], %s874_s30, %s874_s30, %s875_s6  }
  0x35   :  { %s820_s10 = scalar_lea.hbm %s1009_s3, 1024 }
  0x36   :  { %p821_p10 = scmp.ne.s32.totalorder %s1009_s3, %s820_s10  ;;  %p824_p11 = scmp.lt.u32.totalorder %s820_s10, %s1009_s3 }
  0x38   :  { %p826_p12 = pnand %p824_p11, %p821_p10 }
  0x3a   :  { %829 = shalt.err (!%p826_p12)
}
  0x3b   :  { %s830_s15 = scalar_lea.vmem %s948_s22, 1024  ;;  %p835_p0 = scmp.lt.s32.totalorder %s948_s22, %s948_s22 }
  0x3c   :  { %p831_p13 = scmp.ne.s32.totalorder %s948_s22, %s830_s15  ;;  %p836_p1 = scmp.lt.s32.totalorder %s830_s15, %s830_s15 }
  0x3e   :  { %p837_p2 = por %p836_p1, %p835_p0 }
  0x40   :  { %p838_p3 = pnand %p837_p2, %p831_p13 }
  0x42   :  { %841 = shalt.err (!%p838_p3)
}
  0x43   :  { %61 = dma.hbm_to_vmem [thread:$0]  %s1009_s3, 1024, %s948_s22, [#allocation9], %s874_s30, %s874_s30, %s875_s6  }
  0x44   :  { %864 = dma.done.wait [#allocation3], 512  }
  0x45   :  { %865 = vsyncadd [#allocation3], 4294966784 }
  0x46   :  { %866 = dma.done.wait [#allocation6], 2048  }
  0x47   :  { %867 = vsyncadd [#allocation6], 4294965248 }
  0x48   :  { %868 = dma.done.wait [#allocation9], 1024  }
  0x49   :  { %869 = vsyncadd [#allocation9], 4294966272  ;;  %v726_v0 = vld [vmem:[#allocation5] sm:$0xff]   ;;  %v727_v1 = vld [vmem:[#allocation5 + $0x8] sm:$0xff]   ;;  %s878_s19 = smov [#allocation10]  }
  0x4a   :  { %629 = vmatprep.subr.bf16.mxu0 %v726_v0  ;;  %v728_v2 = vld [vmem:[#allocation5 + $0x10] sm:$0xff]   ;;  %v729_v3 = vld [vmem:[#allocation5 + $0x18] sm:$0xff]   ;;  %v734_v4 = vld [vmem:[#allocation2] sm:$0xff]   ;;  %s548_s20 = sshll.u32 %s878_s19, 4  ;;  %s549_s20 = int_to_ptr.vmem [resolvable:$true] %s548_s20 }
  0x4b   :  { %630 = vmatpush3.bf16.msra.mxu0 %v726_v0  ;;  %645 = vmatprep.mubr.bf16.mxu0 %v734_v4  ;;  %v730_v5 = vld [vmem:[#allocation5 + $0x20] sm:$0xff]   ;;  %v739_v7 = vld [vmem:[#allocation7 + $0x8] sm:$0xff]   ;;  %v740_v9 = vld [vmem:[#allocation7 + $0x10] sm:$0xff]   ;;  %p847_p5 = scmp.lt.s32.totalorder %s549_s20, %s549_s20 }
  0x4c   :  { %631 = vmatprep.subr.bf16.mxu0 %v727_v1  ;;  %v738_v6 = vld [vmem:[#allocation7] sm:$0xff]   ;;  %v731_v8 = vld [vmem:[#allocation5 + $0x28] sm:$0xff]   ;;  %v732_v10 = vld [vmem:[#allocation5 + $0x30] sm:$0xff]  }
  0x4d   :  { %653 = vmatprep.subr.bf16.mxu1 %v738_v6  ;;  %v741_v11 = vld [vmem:[#allocation7 + $0x18] sm:$0xff]   ;;  %v742_v13 = vld [vmem:[#allocation7 + $0x20] sm:$0xff]   ;;  %v743_v14 = vld [vmem:[#allocation7 + $0x28] sm:$0xff]  }
  0x4e   :  { %654 = vmatpush3.bf16.msra.mxu1 %v738_v6  ;;  %v733_v12 = vld [vmem:[#allocation5 + $0x38] sm:$0xff]   ;;  %v735_v15 = vld [vmem:[#allocation2 + $0x8] sm:$0xff]   ;;  %v736_v16 = vld [vmem:[#allocation2 + $0x10] sm:$0xff]  }
  0x4f   :  { %632 = vmatpush3.bf16.msra.mxu0 %v727_v1  ;;  %655 = vmatprep.subr.bf16.mxu1 %v739_v7  ;;  %v737_v17 = vld [vmem:[#allocation2 + $0x18] sm:$0xff]   ;;  %v744_v18 = vld [vmem:[#allocation7 + $0x30] sm:$0xff]   ;;  %v746_v20 = vld [vmem:[#allocation8] sm:$0xff]  }
  0x50   :  { %633 = vmatprep.subr.bf16.mxu0 %v728_v2  ;;  %v745_v19 = vld [vmem:[#allocation7 + $0x38] sm:$0xff]   ;;  %v747_v21 = vld [vmem:[#allocation8 + $0x8] sm:$0xff]   ;;  %v748_v22 = vld [vmem:[#allocation8 + $0x10] sm:$0xff]  }
  0x51   :  { %v749_v23 = vld [vmem:[#allocation8 + $0x18] sm:$0xff]   ;;  %v750_v24 = vld [vmem:[#allocation8 + $0x20] sm:$0xff]   ;;  %v751_v25 = vld [vmem:[#allocation8 + $0x28] sm:$0xff]  }
  0x52   :  { %656 = vmatpush3.bf16.msra.mxu1 %v739_v7  ;;  %v562_v26 = vld [vmem:[%s1010_s4] ss:$0 sm:$0xff]  ;;  %v752_v55 = vld [vmem:[#allocation8 + $0x30] sm:$0xff]   ;;  %v753_v56 = vld [vmem:[#allocation8 + $0x38] sm:$0xff]  }
  0x53   :  { %634 = vmatpush3.bf16.msra.mxu0 %v728_v2  ;;  %657 = vmatprep.subr.bf16.mxu1 %v740_v9  ;;  %v575_v57 = vld [vmem:[%s1010_s4 + $0x1] ss:$0 sm:$0xff] }
  0x54   :  { %635 = vmatprep.subr.bf16.mxu0 %v729_v3 }
  0x56   :  { %658 = vmatpush3.bf16.msra.mxu1 %v740_v9 }
  0x57   :  { %636 = vmatpush3.bf16.msra.mxu0 %v729_v3  ;;  %659 = vmatprep.subr.bf16.mxu1 %v741_v11 }
  0x58   :  { %637 = vmatprep.subr.bf16.mxu0 %v730_v5 }
  0x5a   :  { %660 = vmatpush3.bf16.msra.mxu1 %v741_v11 }
  0x5b   :  { %638 = vmatpush3.bf16.msra.mxu0 %v730_v5  ;;  %661 = vmatprep.subr.bf16.mxu1 %v742_v13 }
  0x5c   :  { %639 = vmatprep.subr.bf16.mxu0 %v731_v8 }
  0x5e   :  { %662 = vmatpush3.bf16.msra.mxu1 %v742_v13 }
  0x5f   :  { %640 = vmatpush3.bf16.msra.mxu0 %v731_v8  ;;  %663 = vmatprep.subr.bf16.mxu1 %v743_v14 }
  0x60   :  { %641 = vmatprep.subr.bf16.mxu0 %v732_v10 }
  0x62   :  { %664 = vmatpush3.bf16.msra.mxu1 %v743_v14 }
  0x63   :  { %642 = vmatpush3.bf16.msra.mxu0 %v732_v10  ;;  %665 = vmatprep.subr.bf16.mxu1 %v744_v18 }
  0x64   :  { %643 = vmatprep.subr.bf16.mxu0 %v733_v12 }
  0x66   :  { %666 = vmatpush3.bf16.msra.mxu1 %v744_v18 }
  0x67   :  { %644 = vmatpush3.bf16.msra.mxu0 %v733_v12  ;;  %667 = vmatprep.subr.bf16.mxu1 %v745_v19 }
  0x68   :  { %677 = vmatprep.subr.bf16.mxu0 %v746_v20 }
  0x6a   :  { %646 = vmatmul.mubr.bf16.vlgmr.msra.gmra.mrb[0].mxu0 %v735_v15  ;;  %668 = vmatpush3.bf16.msra.mxu1 %v745_v19 }
  0x6b   :  { %649 = vmatprep.mubr.bf16.mxu0 %v736_v16  ;;  %701 = vmatprep.subr.bf16.mxu1 %v746_v20 }
  0x6c   :  { %678 = vmatpush3.bf16.msra.mxu0 %v746_v20 }
  0x6d   :  { %679 = vmatprep.subr.bf16.mxu0 %v747_v21 }
  0x70   :  { %680 = vmatpush3.bf16.msra.mxu0 %v747_v21 }
  0x71   :  { %681 = vmatprep.subr.bf16.mxu0 %v748_v22 }
  0x72   :  { %650 = vmatmul.mubr.bf16.gmra.mrb[4].mxu0 %v737_v17 }
  0x74   :  { %682 = vmatpush3.bf16.msra.mxu0 %v748_v22 }
  0x75   :  { %683 = vmatprep.subr.bf16.mxu0 %v749_v23 }
  0x78   :  { %684 = vmatpush3.bf16.msra.mxu0 %v749_v23 }
  0x79   :  { %685 = vmatprep.subr.bf16.mxu0 %v750_v24 }
  0x7c   :  { %686 = vmatpush3.bf16.msra.mxu0 %v750_v24 }
  0x7d   :  { %687 = vmatprep.subr.bf16.mxu0 %v751_v25 }
  0x80   :  { %688 = vmatpush3.bf16.msra.mxu0 %v751_v25 }
  0x81   :  { %689 = vmatprep.subr.bf16.mxu0 %v752_v55 }
  0x84   :  { %690 = vmatpush3.bf16.msra.mxu0 %v752_v55 }
  0x85   :  { %691 = vmatprep.subr.bf16.mxu0 %v753_v56 }
  0x88   :  { %692 = vmatpush3.bf16.msra.mxu0 %v753_v56 }
 0x13d   :  { %v647_v27 = vpop.f32.mrb[0].mxu0 }
 0x13e   :  { %v221_v28 = vadd.f32 %v647_v27, %v562_v26  ;;  %v212_v29 = vpop.f32.mrb[1].mxu0 }
 0x13f   :  { %v213_v30 = vadd.f32 %v562_v26, %v212_v29  ;;  %v648_v31 = vpop.f32.mrb[2].mxu0 }
 0x140   :  { %v224_v32 = vadd.f32 %v648_v31, %v562_v26  ;;  %v215_v33 = vpop.f32.mrb[3].mxu0  ;;  %v245_v35 = vmax.f32 %v221_v28, 0.0 }
 0x141   :  { %v216_v34 = vadd.f32 %v562_v26, %v215_v33  ;;  %v243_v37 = vmax.f32 %v213_v30, 0.0 }
 0x142   :  { %v246_v36 = vmax.f32 %v224_v32, 0.0 }
 0x143   :  { %v244_v38 = vmax.f32 %v216_v34, 0.0 }
 0x144   :  { %v252_v39 = vpack.c.bf16 %v246_v36, %v245_v35 }
 0x145   :  { %v651_v40 = vpop.f32.mrb[4].mxu0  ;;  %v251_v41 = vpack.c.bf16 %v244_v38, %v243_v37 }
 0x146   :  { %v237_v42 = vadd.f32 %v651_v40, %v562_v26  ;;  %v228_v43 = vpop.f32.mrb[5].mxu0 }
 0x147   :  { %v229_v44 = vadd.f32 %v562_v26, %v228_v43  ;;  %v652_v45 = vpop.f32.mrb[6].mxu0  ;;  %669 = vmatprep.mubr.bf16.mxu1 %v251_v41 }
 0x148   :  { %v240_v46 = vadd.f32 %v652_v45, %v562_v26  ;;  %v231_v47 = vpop.f32.mrb[7].mxu0  ;;  %670 = vmatmul.mubr.bf16.vlgmr.msra.gmra.mrb[0].mxu1 %v252_v39  ;;  %v249_v49 = vmax.f32 %v237_v42, 0.0 }
 0x149   :  { %v232_v48 = vadd.f32 %v562_v26, %v231_v47  ;;  %709 = vmatpush3.bf16.msra.mxu1 %v746_v20  ;;  %v247_v51 = vmax.f32 %v229_v44, 0.0 }
 0x14a   :  { %v250_v50 = vmax.f32 %v240_v46, 0.0  ;;  %702 = vmatprep.subr.bf16.mxu1 %v747_v21 }
 0x14b   :  { %v248_v52 = vmax.f32 %v232_v48, 0.0 }
 0x14c   :  { %v254_v53 = vpack.c.bf16 %v250_v50, %v249_v49 }
 0x14d   :  { %v253_v54 = vpack.c.bf16 %v248_v52, %v247_v51  ;;  %710 = vmatpush3.bf16.msra.mxu1 %v747_v21 }
 0x14e   :  { %703 = vmatprep.subr.bf16.mxu1 %v748_v22 }
 0x14f   :  { %673 = vmatprep.mubr.bf16.mxu1 %v253_v54 }
 0x150   :  { %674 = vmatmul.mubr.bf16.gmra.mrb[4].mxu1 %v254_v53 }
 0x151   :  { %711 = vmatpush3.bf16.msra.mxu1 %v748_v22  ;;  %v584_v22 = vld [vmem:[%s1010_s4 + $0x2] ss:$0 sm:$0xff]  ;;  %s842_s4 = scalar_lea.vmem %s549_s20, 1024 }
 0x152   :  { %704 = vmatprep.subr.bf16.mxu1 %v749_v23  ;;  %p843_p4 = scmp.ne.s32.totalorder %s549_s20, %s842_s4  ;;  %p848_p6 = scmp.lt.s32.totalorder %s842_s4, %s842_s4 }
 0x154   :  { %p849_p7 = por %p848_p6, %p847_p5 }
 0x155   :  { %712 = vmatpush3.bf16.msra.mxu1 %v749_v23 }
 0x156   :  { %705 = vmatprep.subr.bf16.mxu1 %v750_v24  ;;  %p850_p8 = pnand %p849_p7, %p843_p4 }
 0x159   :  { %713 = vmatpush3.bf16.msra.mxu1 %v750_v24 }
 0x15a   :  { %706 = vmatprep.subr.bf16.mxu1 %v751_v25 }
 0x15d   :  { %714 = vmatpush3.bf16.msra.mxu1 %v751_v25 }
 0x15e   :  { %707 = vmatprep.subr.bf16.mxu1 %v752_v55 }
 0x161   :  { %715 = vmatpush3.bf16.msra.mxu1 %v752_v55 }
 0x162   :  { %708 = vmatprep.subr.bf16.mxu1 %v753_v56 }
 0x165   :  { %716 = vmatpush3.bf16.msra.mxu1 %v753_v56 }
 0x21b   :  { %v671_v58 = vpop.f32.mrb[0].mxu1 }
 0x21c   :  { %v367_v59 = vadd.f32 %v671_v58, %v575_v57  ;;  %v358_v60 = vpop.f32.mrb[1].mxu1 }
 0x21d   :  { %v359_v61 = vadd.f32 %v575_v57, %v358_v60  ;;  %v672_v62 = vpop.f32.mrb[2].mxu1 }
 0x21e   :  { %v370_v63 = vadd.f32 %v672_v62, %v575_v57  ;;  %v361_v0 = vpop.f32.mrb[3].mxu1  ;;  %v391_v2 = vmax.f32 %v367_v59, 0.0 }
 0x21f   :  { %v362_v1 = vadd.f32 %v575_v57, %v361_v0  ;;  %v389_v4 = vmax.f32 %v359_v61, 0.0 }
 0x220   :  { %v392_v3 = vmax.f32 %v370_v63, 0.0 }
 0x221   :  { %v390_v5 = vmax.f32 %v362_v1, 0.0 }
 0x222   :  { %v398_v6 = vpack.c.bf16 %v392_v3, %v391_v2 }
 0x223   :  { %v397_v7 = vpack.c.bf16 %v390_v5, %v389_v4  ;;  %v675_v8 = vpop.f32.mrb[4].mxu1 }
 0x224   :  { %v383_v9 = vadd.f32 %v675_v8, %v575_v57  ;;  %v374_v10 = vpop.f32.mrb[5].mxu1 }
 0x225   :  { %v375_v11 = vadd.f32 %v575_v57, %v374_v10  ;;  %v676_v12 = vpop.f32.mrb[6].mxu1  ;;  %693 = vmatprep.mubr.bf16.mxu0 %v397_v7 }
 0x226   :  { %v386_v13 = vadd.f32 %v676_v12, %v575_v57  ;;  %v377_v14 = vpop.f32.mrb[7].mxu1  ;;  %694 = vmatmul.mubr.bf16.vlgmr.msra.gmra.mrb[8].mxu0 %v398_v6  ;;  %v395_v16 = vmax.f32 %v383_v9, 0.0 }
 0x227   :  { %v378_v15 = vadd.f32 %v575_v57, %v377_v14  ;;  %v393_v18 = vmax.f32 %v375_v11, 0.0 }
 0x228   :  { %v396_v17 = vmax.f32 %v386_v13, 0.0 }
 0x229   :  { %v394_v19 = vmax.f32 %v378_v15, 0.0 }
 0x22a   :  { %v400_v20 = vpack.c.bf16 %v396_v17, %v395_v16 }
 0x22b   :  { %v399_v21 = vpack.c.bf16 %v394_v19, %v393_v18 }
 0x22d   :  { %697 = vmatprep.mubr.bf16.mxu1 %v399_v21 }
 0x22e   :  { %698 = vmatmul.mubr.bf16.vlgmr.msra.gmra.mrb[8].mxu1 %v400_v20 }
 0x2f9   :  { %v695_v23 = vpop.f32.mrb[8].mxu0 }
 0x2fa   :  { %v513_v24 = vadd.f32 %v695_v23, %v584_v22  ;;  %v504_v25 = vpop.f32.mrb[9].mxu0 }
 0x2fb   :  { %v505_v26 = vadd.f32 %v584_v22, %v504_v25  ;;  %v696_v27 = vpop.f32.mrb[10].mxu0 }
 0x2fc   :  { %537 = vst [vmem:[#allocation10 + $0x10] sm:$0xff] %v513_v24  ;;  %v516_v28 = vadd.f32 %v696_v27, %v584_v22  ;;  %v507_v29 = vpop.f32.mrb[11].mxu0 }
 0x2fd   :  { %535 = vst [vmem:[#allocation10] sm:$0xff] %v505_v26  ;;  %v508_v30 = vadd.f32 %v584_v22, %v507_v29 }
 0x2fe   :  { %538 = vst [vmem:[#allocation10 + $0x18] sm:$0xff] %v516_v28 }
 0x2ff   :  { %536 = vst [vmem:[#allocation10 + $0x8] sm:$0xff] %v508_v30 }
 0x301   :  { %v699_v31 = vpop.f32.mrb[8].mxu1 }
 0x302   :  { %v529_v32 = vadd.f32 %v699_v31, %v584_v22  ;;  %v520_v33 = vpop.f32.mrb[9].mxu1 }
 0x303   :  { %v521_v34 = vadd.f32 %v584_v22, %v520_v33  ;;  %v700_v35 = vpop.f32.mrb[10].mxu1 }
 0x304   :  { %541 = vst [vmem:[#allocation10 + $0x30] sm:$0xff] %v529_v32  ;;  %v532_v36 = vadd.f32 %v700_v35, %v584_v22  ;;  %v523_v37 = vpop.f32.mrb[11].mxu1 }
 0x305   :  { %539 = vst [vmem:[#allocation10 + $0x20] sm:$0xff] %v521_v34  ;;  %v524_v38 = vadd.f32 %v584_v22, %v523_v37 }
 0x306   :  { %542 = vst [vmem:[#allocation10 + $0x38] sm:$0xff] %v532_v36 }
 0x307   :  { %540 = vst [vmem:[#allocation10 + $0x28] sm:$0xff] %v524_v38 }
 0x308   :  { %853 = shalt.err (!%p850_p8)
}
 0x309   :  { %s854_s24 = scalar_lea.hbm %s1011_s5, 1024 }
 0x30a   :  { %p855_p9 = scmp.ne.s32.totalorder %s1011_s5, %s854_s24  ;;  %p858_p10 = scmp.lt.u32.totalorder %s854_s24, %s1011_s5 }
 0x30c   :  { %p860_p11 = pnand %p858_p10, %p855_p9 }
 0x30e   :  { %863 = shalt.err (!%p860_p11)
}
 0x30f   :  { %s879_s29 = smov 128   ;;  %s880_s0 = smov 8  }
 0x310   :  { %554 = dma.vmem_to_hbm [thread:$0]  %s549_s20, 1024, %s1011_s5, [#allocation4], %s879_s29, %s879_s29, %s880_s0  }
 0x311   :  { %870 = dma.done.wait [#allocation4], 1024  }
 0x312   :  { %871 = vsyncadd [#allocation4], 4294966272 }
 0x313   :  { %558 = vsyncpa [#allocation3], 1 }
 0x314   :  { %559 = vsyncpa [#allocation6], 1 }
 0x315   :  { %560 = vsyncpa [#allocation9], 1 }
 0x316   :  { %561 = vsyncpa [#allocation4], 1 }

</bundles_post_ra>
